<compile_context>
chip_gen: v7x
topology: tpu7x:2x2x1
jax: 0.10.0
libtpu: 0.0.40
codegen_flags: <defaults>
</compile_context>

<pallas_src>
import functools

import jax
import jax.numpy as jnp
from jax import lax
from jax.experimental import pallas as pl
from jax.experimental.pallas import tpu as pltpu


def _round_up(x: int, m: int) -> int:
    return ((x + m - 1) // m) * m


def _pick_tile(m: int) -> int:
    """Half-rows per tile (rows taken from each of z_i and z_j per block)."""
    for t in (256, 128):
        if m % t == 0:
            return t
    if m >= 128:
        return 128                      # pad M up to a multiple of 128
    return max(8, _round_up(m, 8))      # small M: one (possibly padded) tile


def _nt_xent_kernel(zi_row_ref, zj_row_ref, zi_col_ref, zj_col_ref,
                    out_ref, m_scr, l_scr, *,
                    inv_temp: float, m_real: int, tile: int, use_bf16: bool):
    i = pl.program_id(0)            # row-block index (over the M axis)
    k = pl.program_id(1)            # col-block index (reduction axis)
    t = tile
    eps = jnp.float32(1e-8)         # torch CosineSimilarity clamps ||a||*||b|| at 1e-8
    neg_big = jnp.float32(-1e30)

    # ---- normalize the row blocks (O(T*D); negligible vs the matmul) ------
    qi = zi_row_ref[...].astype(jnp.float32)                       # (T, D)
    qj = zj_row_ref[...].astype(jnp.float32)                       # (T, D)
    qi_hat = qi * lax.rsqrt(jnp.maximum(jnp.sum(qi * qi, -1, keepdims=True), eps))
    qj_hat = qj * lax.rsqrt(jnp.maximum(jnp.sum(qj * qj, -1, keepdims=True), eps))
    # fold 1/temperature into the row operand (no NxN divide anywhere)
    q = jnp.concatenate([qi_hat, qj_hat], axis=0) * jnp.float32(inv_temp)   # (2T, D)

    # ---- normalize the column blocks ---------------------------------------
    kc = jnp.concatenate([zi_col_ref[...], zj_col_ref[...]],
                         axis=0).astype(jnp.float32)               # (2T, D)
    k_hat = kc * lax.rsqrt(jnp.maximum(jnp.sum(kc * kc, -1, keepdims=True), eps))

    # ---- similarity tile: contract last dims directly (no transpose) -------
    if use_bf16:
        q_mm, k_mm = q.astype(jnp.bfloat16), k_hat.astype(jnp.bfloat16)
    else:
        q_mm, k_mm = q, k_hat
    sim = lax.dot_general(q_mm, k_mm, (((1,), (1,)), ((), ())),
                          preferred_element_type=jnp.float32)      # (2T, 2T)

    # ---- mask self-similarity (diag tiles only) and padded columns ---------
    r_idx = lax.broadcasted_iota(jnp.int32, (2 * t, 2 * t), 0)
    c_idx = lax.broadcasted_iota(jnp.int32, (2 * t, 2 * t), 1)
    mask = jnp.logical_and(i == k, r_idx == c_idx)
    if m_real % t != 0:                      # static: only emitted when padded
        c_local = jnp.where(c_idx < t, c_idx, c_idx - t)
        mask = jnp.logical_or(mask, (k * t + c_local) >= m_real)
    sim = jnp.where(mask, neg_big, sim)

    # ---- online logsumexp across column blocks -----------------------------
    @pl.when(k == 0)
    def _init():
        m_scr[...] = jnp.full((2 * t, 1), -1e30, jnp.float32)
        l_scr[...] = jnp.zeros((2 * t, 1), jnp.float32)

    m_prev = m_scr[...]                                            # (2T, 1)
    m_new = jnp.maximum(m_prev, jnp.max(sim, axis=-1, keepdims=True))
    alpha = jnp.exp(m_prev - m_new)
    l_scr[...] = alpha * l_scr[...] + jnp.sum(jnp.exp(sim - m_new),
                                              axis=-1, keepdims=True)
    m_scr[...] = m_new

    # ---- finalize this row block -------------------------------------------
    @pl.when(k == pl.num_programs(1) - 1)
    def _finalize():
        lse = m_scr[...] + jnp.log(l_scr[...])                     # (2T, 1)
        # positive logit = <zhat_i[r], zhat_j[r]> / temp (same for both halves)
        pos = jnp.sum(qi_hat * qj_hat, axis=-1, keepdims=True) * jnp.float32(inv_temp)
        li = lse[:t] - pos
        lj = lse[t:] - pos
        if m_real % t != 0:                                        # zero padded rows
            r_half = lax.broadcasted_iota(jnp.int32, (t, 1), 0)
            row_ok = (i * t + r_half) < m_real
            li = jnp.where(row_ok, li, 0.0)
            lj = jnp.where(row_ok, lj, 0.0)
        out_ref[0] = li
        out_ref[1] = lj


def nt_xent_pallas(z_i, z_j, temperature: float, batch_size: int,
                   world_size: int, *, use_bf16_matmul: bool = False):
    m = batch_size * world_size
    n = 2 * m
    d = z_i.shape[-1]
    assert z_i.shape == (m, d) and z_j.shape == (m, d)

    t = _pick_tile(m)
    m_pad = _round_up(m, t)
    if m_pad != m:
        pad = ((0, m_pad - m), (0, 0))
        z_i = jnp.pad(z_i, pad)
        z_j = jnp.pad(z_j, pad)
    g = m_pad // t                      # number of row blocks == col blocks

    kernel = functools.partial(
        _nt_xent_kernel, inv_temp=1.0 / float(temperature), m_real=m,
        tile=t, use_bf16=use_bf16_matmul)

    row_spec = pl.BlockSpec((t, d), lambda i, k: (i, 0))   # resident across k
    col_spec = pl.BlockSpec((t, d), lambda i, k: (k, 0))   # streamed over k

    per_row = pl.pallas_call(
        kernel,
        out_shape=jax.ShapeDtypeStruct((2, m_pad, 1), jnp.float32),
        grid=(g, g),
        in_specs=[row_spec, row_spec, col_spec, col_spec],
        out_specs=pl.BlockSpec((2, t, 1), lambda i, k: (0, i, 0)),
        scratch_shapes=[pltpu.VMEM((2 * t, 1), jnp.float32),   # running max
                        pltpu.VMEM((2 * t, 1), jnp.float32)],  # running sum
        compiler_params=pltpu.CompilerParams(
            dimension_semantics=("parallel", "arbitrary"),
            vmem_limit_bytes=64 * 1024 * 1024),
    )(z_i, z_j, z_i, z_j)

    return jnp.sum(per_row) / jnp.float32(n)


def nt_xent_ref(z_i, z_j, temperature: float, batch_size: int, world_size: int):
    """Plain-JAX reference mirroring the PyTorch forward."""
    half = batch_size * world_size
    n = 2 * half
    z = jnp.concatenate([z_i, z_j], axis=0).astype(jnp.float32)
    dots = z @ z.T
    norms = jnp.linalg.norm(z, axis=-1, keepdims=True)
    sim = dots / jnp.maximum(norms * norms.T, 1e-8) / temperature
    row = jnp.arange(n)[:, None]
    col = jnp.arange(n)[None, :]
    sim_no_diag = jnp.where(row == col, -jnp.inf, sim)
    lse = jax.scipy.special.logsumexp(sim_no_diag, axis=-1)
    pos = sim[jnp.arange(n), (jnp.arange(n) + half) % n]
    return jnp.sum(lse - pos) / n


if __name__ == "__main__":
    batch_size = 8
    world_size = 1
    temperature = 0.5
    feat_dim = 32

    key = jax.random.PRNGKey(0)
    k1, k2 = jax.random.split(key)
    z_i = jax.random.normal(k1, (batch_size * world_size, feat_dim), jnp.float32)
    z_j = jax.random.normal(k2, (batch_size * world_size, feat_dim), jnp.float32)

    loss = nt_xent_pallas(z_i, z_j, temperature, batch_size, world_size)
    jax.block_until_ready(loss)

    ref = nt_xent_ref(z_i, z_j, temperature, batch_size, world_size)
    assert jnp.allclose(loss, ref, rtol=1e-4, atol=1e-4), (loss, ref)

    print("KERNEL_OK")
</pallas_src>

<mosaic_0001>
module attributes {stable_mosaic.version = 11 : i64} {
  func.func @_nt_xent_kernel(%arg0: i32, %arg1: i32, %arg2: memref<8x32xf32, #tpu.memory_space<vmem>>, %arg3: memref<8x32xf32, #tpu.memory_space<vmem>>, %arg4: memref<8x32xf32, #tpu.memory_space<vmem>>, %arg5: memref<8x32xf32, #tpu.memory_space<vmem>>, %arg6: memref<2x8x1xf32, #tpu.memory_space<vmem>>, %arg7: memref<16x1xf32, #tpu.memory_space<vmem>>, %arg8: memref<16x1xf32, #tpu.memory_space<vmem>>) attributes {dimension_semantics = [#tpu.dimension_semantics<parallel>, #tpu.dimension_semantics<arbitrary>], iteration_bounds = array<i64: 1, 1>, scalar_prefetch = 0 : i64, scratch_operands = 2 : i64, tpu.core_type = #tpu.core_type<tc>, window_params = [{transform_indices = @transform_0, window_bounds = array<i64: 8, 32>}, {transform_indices = @transform_1, window_bounds = array<i64: 8, 32>}, {transform_indices = @transform_2, window_bounds = array<i64: 8, 32>}, {transform_indices = @transform_3, window_bounds = array<i64: 8, 32>}, {transform_indices = @transform_4, window_bounds = array<i64: 2, 8, 1>}]} {
    %c0 = arith.constant 0 : index
    %c0_0 = arith.constant 0 : index
    %0 = vector.load %arg2[%c0, %c0_0] : memref<8x32xf32, #tpu.memory_space<vmem>>, vector<8x32xf32>
    %c0_1 = arith.constant 0 : index
    %c0_2 = arith.constant 0 : index
    %1 = vector.load %arg3[%c0_1, %c0_2] : memref<8x32xf32, #tpu.memory_space<vmem>>, vector<8x32xf32>
    %2 = arith.mulf %0, %0 : vector<8x32xf32>
    %cst = arith.constant dense<0.000000e+00> : vector<8xf32>
    %3 = vector.multi_reduction <add>, %2, %cst [1] : vector<8x32xf32> to vector<8xf32>
    %4 = vector.shape_cast %3 : vector<8xf32> to vector<8x1xf32>
    %cst_3 = arith.constant 9.99999993E-9 : f32
    %5 = vector.broadcast %cst_3 : f32 to vector<8x1xf32>
    %6 = arith.maximumf %4, %5 : vector<8x1xf32>
    %7 = math.rsqrt %6 : vector<8x1xf32>
    %8 = vector.broadcast %7 : vector<8x1xf32> to vector<8x32xf32>
    %9 = arith.mulf %0, %8 : vector<8x32xf32>
    %10 = arith.mulf %1, %1 : vector<8x32xf32>
    %cst_4 = arith.constant dense<0.000000e+00> : vector<8xf32>
    %11 = vector.multi_reduction <add>, %10, %cst_4 [1] : vector<8x32xf32> to vector<8xf32>
    %12 = vector.shape_cast %11 : vector<8xf32> to vector<8x1xf32>
    %cst_5 = arith.constant 9.99999993E-9 : f32
    %13 = vector.broadcast %cst_5 : f32 to vector<8x1xf32>
    %14 = arith.maximumf %12, %13 : vector<8x1xf32>
    %15 = math.rsqrt %14 : vector<8x1xf32>
    %16 = vector.broadcast %15 : vector<8x1xf32> to vector<8x32xf32>
    %17 = arith.mulf %1, %16 : vector<8x32xf32>
    %18 = tpu.concatenate %9, %17 in 0 : vector<8x32xf32>, vector<8x32xf32> -> vector<16x32xf32>
    %cst_6 = arith.constant 2.000000e+00 : f32
    %19 = vector.broadcast %cst_6 : f32 to vector<16x32xf32>
    %20 = arith.mulf %18, %19 : vector<16x32xf32>
    %c0_7 = arith.constant 0 : index
    %c0_8 = arith.constant 0 : index
    %21 = vector.load %arg4[%c0_7, %c0_8] : memref<8x32xf32, #tpu.memory_space<vmem>>, vector<8x32xf32>
    %c0_9 = arith.constant 0 : index
    %c0_10 = arith.constant 0 : index
    %22 = vector.load %arg5[%c0_9, %c0_10] : memref<8x32xf32, #tpu.memory_space<vmem>>, vector<8x32xf32>
    %23 = tpu.concatenate %21, %22 in 0 : vector<8x32xf32>, vector<8x32xf32> -> vector<16x32xf32>
    %24 = arith.mulf %23, %23 : vector<16x32xf32>
    %cst_11 = arith.constant dense<0.000000e+00> : vector<16xf32>
    %25 = vector.multi_reduction <add>, %24, %cst_11 [1] : vector<16x32xf32> to vector<16xf32>
    %26 = vector.shape_cast %25 : vector<16xf32> to vector<16x1xf32>
    %cst_12 = arith.constant 9.99999993E-9 : f32
    %27 = vector.broadcast %cst_12 : f32 to vector<16x1xf32>
    %28 = arith.maximumf %26, %27 : vector<16x1xf32>
    %29 = math.rsqrt %28 : vector<16x1xf32>
    %30 = vector.broadcast %29 : vector<16x1xf32> to vector<16x32xf32>
    %31 = arith.mulf %23, %30 : vector<16x32xf32>
    %cst_13 = arith.constant dense<0.000000e+00> : vector<16x16xf32>
    %32 = tpu.matmul %20, %31, %cst_13 {dimension_numbers = #tpu.dot_dimension_numbers<[1], [1], [0], [0], [0, 0, 1, 0], [], []>} : vector<16x32xf32>, vector<16x32xf32>, vector<16x16xf32> -> vector<16x16xf32>
    %33 = tpu.iota {dimensions = array<i32: 0>} : vector<16x16xi32>
    %34 = tpu.iota {dimensions = array<i32: 1>} : vector<16x16xi32>
    %35 = arith.cmpi eq, %arg0, %arg1 : i32
    %36 = arith.cmpi eq, %33, %34 : vector<16x16xi32>
    %37 = vector.broadcast %35 : i1 to vector<16x16xi1>
    %38 = arith.andi %37, %36 : vector<16x16xi1>
    %cst_14 = arith.constant -1.000000e+30 : f32
    %39 = vector.broadcast %cst_14 : f32 to vector<16x16xf32>
    %40 = arith.select %38, %39, %32 : vector<16x16xi1>, vector<16x16xf32>
    %c0_i32 = arith.constant 0 : i32
    %41 = arith.cmpi eq, %arg1, %c0_i32 : i32
    %42 = arith.extui %41 : i1 to i32
    %c0_i32_15 = arith.constant 0 : i32
    %43 = arith.cmpi ne, %42, %c0_i32_15 : i32
    scf.if %43 {
      %cst_28 = arith.constant -1.000000e+30 : f32
      %63 = vector.broadcast %cst_28 : f32 to vector<16x1xf32>
      %c0_29 = arith.constant 0 : index
      %c0_30 = arith.constant 0 : index
      %64 = vector.load %arg7[%c0_29, %c0_30] : memref<16x1xf32, #tpu.memory_space<vmem>>, vector<16x1xf32>
      tpu.vector_store %arg7[%c0_29, %c0_30], %63 {strides = array<i32>} : memref<16x1xf32, #tpu.memory_space<vmem>>, vector<16x1xf32>,
      %cst_31 = arith.constant 0.000000e+00 : f32
      %65 = vector.broadcast %cst_31 : f32 to vector<16x1xf32>
      %c0_32 = arith.constant 0 : index
      %c0_33 = arith.constant 0 : index
      %66 = vector.load %arg8[%c0_32, %c0_33] : memref<16x1xf32, #tpu.memory_space<vmem>>, vector<16x1xf32>
      tpu.vector_store %arg8[%c0_32, %c0_33], %65 {strides = array<i32>} : memref<16x1xf32, #tpu.memory_space<vmem>>, vector<16x1xf32>,
    } else {
    }
    %c0_16 = arith.constant 0 : index
    %c0_17 = arith.constant 0 : index
    %44 = vector.load %arg7[%c0_16, %c0_17] : memref<16x1xf32, #tpu.memory_space<vmem>>, vector<16x1xf32>
    %cst_18 = arith.constant dense<0xFF800000> : vector<16xf32>
    %45 = vector.multi_reduction <maximumf>, %40, %cst_18 [1] : vector<16x16xf32> to vector<16xf32>
    %46 = vector.shape_cast %45 : vector<16xf32> to vector<16x1xf32>
    %47 = arith.maximumf %44, %46 : vector<16x1xf32>
    %48 = arith.subf %44, %47 : vector<16x1xf32>
    %49 = math.exp %48 : vector<16x1xf32>
    %c0_19 = arith.constant 0 : index
    %c0_20 = arith.constant 0 : index
    %50 = vector.load %arg8[%c0_19, %c0_20] : memref<16x1xf32, #tpu.memory_space<vmem>>, vector<16x1xf32>
    %51 = arith.mulf %49, %50 : vector<16x1xf32>
    %52 = vector.broadcast %47 : vector<16x1xf32> to vector<16x16xf32>
    %53 = arith.subf %40, %52 : vector<16x16xf32>
    %54 = math.exp %53 : vector<16x16xf32>
    %cst_21 = arith.constant dense<0.000000e+00> : vector<16xf32>
    %55 = vector.multi_reduction <add>, %54, %cst_21 [1] : vector<16x16xf32> to vector<16xf32>
    %56 = vector.shape_cast %55 : vector<16xf32> to vector<16x1xf32>
    %57 = arith.addf %51, %56 : vector<16x1xf32>
    %c0_22 = arith.constant 0 : index
    %c0_23 = arith.constant 0 : index
    %58 = vector.load %arg8[%c0_22, %c0_23] : memref<16x1xf32, #tpu.memory_space<vmem>>, vector<16x1xf32>
    tpu.vector_store %arg8[%c0_22, %c0_23], %57 {strides = array<i32>} : memref<16x1xf32, #tpu.memory_space<vmem>>, vector<16x1xf32>,
    %c0_24 = arith.constant 0 : index
    %c0_25 = arith.constant 0 : index
    %59 = vector.load %arg7[%c0_24, %c0_25] : memref<16x1xf32, #tpu.memory_space<vmem>>, vector<16x1xf32>
    tpu.vector_store %arg7[%c0_24, %c0_25], %47 {strides = array<i32>} : memref<16x1xf32, #tpu.memory_space<vmem>>, vector<16x1xf32>,
    %c0_i32_26 = arith.constant 0 : i32
    %60 = arith.cmpi eq, %arg1, %c0_i32_26 : i32
    %61 = arith.extui %60 : i1 to i32
    %c0_i32_27 = arith.constant 0 : i32
    %62 = arith.cmpi ne, %61, %c0_i32_27 : i32
    scf.if %62 {
      %c0_28 = arith.constant 0 : index
      %c0_29 = arith.constant 0 : index
      %63 = vector.load %arg7[%c0_28, %c0_29] : memref<16x1xf32, #tpu.memory_space<vmem>>, vector<16x1xf32>
      %c0_30 = arith.constant 0 : index
      %c0_31 = arith.constant 0 : index
      %64 = vector.load %arg8[%c0_30, %c0_31] : memref<16x1xf32, #tpu.memory_space<vmem>>, vector<16x1xf32>
      %65 = math.log %64 : vector<16x1xf32>
      %66 = arith.addf %63, %65 : vector<16x1xf32>
      %67 = arith.mulf %9, %17 : vector<8x32xf32>
      %cst_32 = arith.constant dense<0.000000e+00> : vector<8xf32>
      %68 = vector.multi_reduction <add>, %67, %cst_32 [1] : vector<8x32xf32> to vector<8xf32>
      %69 = vector.shape_cast %68 : vector<8xf32> to vector<8x1xf32>
      %cst_33 = arith.constant 2.000000e+00 : f32
      %70 = vector.broadcast %cst_33 : f32 to vector<8x1xf32>
      %71 = arith.mulf %69, %70 : vector<8x1xf32>
      %72 = vector.extract_strided_slice %66 {offsets = [0, 0], sizes = [8, 1], strides = [1, 1]} : vector<16x1xf32> to vector<8x1xf32>
      %73 = arith.subf %72, %71 : vector<8x1xf32>
      %74 = vector.extract_strided_slice %66 {offsets = [8, 0], sizes = [8, 1], strides = [1, 1]} : vector<16x1xf32> to vector<8x1xf32>
      %75 = arith.subf %74, %71 : vector<8x1xf32>
      %c0_34 = arith.constant 0 : index
      %c0_35 = arith.constant 0 : index
      %c0_36 = arith.constant 0 : index
      %76 = vector.load %arg6[%c0_34, %c0_35, %c0_36] : memref<2x8x1xf32, #tpu.memory_space<vmem>>, vector<1x8x1xf32>
      %77 = vector.shape_cast %76 : vector<1x8x1xf32> to vector<8x1xf32>
      %78 = vector.shape_cast %73 : vector<8x1xf32> to vector<1x8x1xf32>
      tpu.vector_store %arg6[%c0_34, %c0_35, %c0_36], %78 {strides = array<i32>} : memref<2x8x1xf32, #tpu.memory_space<vmem>>, vector<1x8x1xf32>,
      %c1 = arith.constant 1 : index
      %c0_37 = arith.constant 0 : index
      %c0_38 = arith.constant 0 : index
      %79 = vector.load %arg6[%c1, %c0_37, %c0_38] : memref<2x8x1xf32, #tpu.memory_space<vmem>>, vector<1x8x1xf32>
      %80 = vector.shape_cast %79 : vector<1x8x1xf32> to vector<8x1xf32>
      %81 = vector.shape_cast %75 : vector<8x1xf32> to vector<1x8x1xf32>
      tpu.vector_store %arg6[%c1, %c0_37, %c0_38], %81 {strides = array<i32>} : memref<2x8x1xf32, #tpu.memory_space<vmem>>, vector<1x8x1xf32>,
    } else {
    }
    return
  }
  func.func @transform_0(%arg0: i32, %arg1: i32) -> (i32, i32) {
    %c0_i32 = arith.constant 0 : i32
    %c0_i32_0 = arith.constant 0 : i32
    return %arg0, %c0_i32 : i32, i32
  }
  func.func @transform_1(%arg0: i32, %arg1: i32) -> (i32, i32) {
    %c0_i32 = arith.constant 0 : i32
    %c0_i32_0 = arith.constant 0 : i32
    return %arg0, %c0_i32 : i32, i32
  }
  func.func @transform_2(%arg0: i32, %arg1: i32) -> (i32, i32) {
    %c0_i32 = arith.constant 0 : i32
    %c0_i32_0 = arith.constant 0 : i32
    return %arg1, %c0_i32 : i32, i32
  }
  func.func @transform_3(%arg0: i32, %arg1: i32) -> (i32, i32) {
    %c0_i32 = arith.constant 0 : i32
    %c0_i32_0 = arith.constant 0 : i32
    return %arg1, %c0_i32 : i32, i32
  }
  func.func @transform_4(%arg0: i32, %arg1: i32) -> (i32, i32, i32) {
    %c0_i32 = arith.constant 0 : i32
    %c0_i32_0 = arith.constant 0 : i32
    %c0_i32_1 = arith.constant 0 : i32
    return %c0_i32, %arg0, %c0_i32_0 : i32, i32, i32
  }
}

</mosaic_0001>

<bundles_post_ra>
// kernel: tpu_custom_call.1
= control target key start
LH: loop header
LB: loop body
LE: loop exit
PB: predicated region body
PF: predicated region fallthrough
CT: control target
= control target key end

     0   :  { %9 = vsyncpa [#allocation5], 0  ;;  %s592_s0 = inlined_call_operand.hbm [shape: f32[8,32], index: 0, kind: input, shape index: {}]   ;;  %s593_s1 = inlined_call_operand.hbm [shape: f32[8,32], index: 1, kind: input, shape index: {}]   ;;  %s594_s2 = inlined_call_operand.hbm [shape: f32[8,32], index: 2, kind: input, shape index: {}]   ;;  %s595_s3 = inlined_call_operand.hbm [shape: f32[8,32], index: 3, kind: input, shape index: {}]   ;;  %s596_s4 = inlined_call_operand.hbm [shape: f32[2,8,1], index: 4, kind: output, shape index: {}]  }
   0x1   :  { %10 = vsyncpa [#allocation8], 0 }
   0x2   :  { %11 = vsyncpa [#allocation11], 0 }
   0x3   :  { %12 = vsyncpa [#allocation6], 0  ;;  %s474_s15 = smov [#allocation7]   ;;  %s475_s17 = smov [#allocation4]  }
   0x4   :  { %s29_s16 = sshll.u32 %s474_s15, 4  ;;  %s19_s18 = sshll.u32 %s475_s17, 4  ;;  %s30_s16 = int_to_ptr.vmem [resolvable:$true] %s29_s16  ;;  %s20_s18 = int_to_ptr.vmem [resolvable:$true] %s19_s18 }
   0x5   :  { %s356_s21 = scalar_lea.hbm %s593_s1, 128 }
   0x6   :  { %p357_p0 = scmp.ne.s32.totalorder %s593_s1, %s356_s21  ;;  %p360_p1 = scmp.lt.u32.totalorder %s356_s21, %s593_s1 }
   0x8   :  { %p362_p2 = pnand %p360_p1, %p357_p0 }
   0xa   :  { %365 = shalt.err (!%p362_p2)
}
   0xb   :  { %s366_s26 = scalar_lea.vmem %s30_s16, 128  ;;  %p371_p4 = scmp.lt.s32.totalorder %s30_s16, %s30_s16 }
   0xc   :  { %p367_p3 = scmp.ne.s32.totalorder %s30_s16, %s366_s26  ;;  %p372_p5 = scmp.lt.s32.totalorder %s366_s26, %s366_s26 }
   0xe   :  { %p373_p6 = por %p372_p5, %p371_p4 }
  0x10   :  { %p374_p7 = pnand %p373_p6, %p367_p3 }
  0x12   :  { %377 = shalt.err (!%p374_p7)
}
  0x13   :  { %32 = dma.hbm_to_vmem [thread:$0]  %s593_s1, 128, %s30_s16, [#allocation8]  }
  0x14   :  { %s378_s5 = scalar_lea.hbm %s592_s0, 128 }
  0x15   :  { %p379_p8 = scmp.ne.s32.totalorder %s592_s0, %s378_s5  ;;  %p382_p9 = scmp.lt.u32.totalorder %s378_s5, %s592_s0 }
  0x17   :  { %p384_p10 = pnand %p382_p9, %p379_p8 }
  0x19   :  { %387 = shalt.err (!%p384_p10)
}
  0x1a   :  { %s388_s10 = scalar_lea.vmem %s20_s18, 128  ;;  %p393_p12 = scmp.lt.s32.totalorder %s20_s18, %s20_s18 }
  0x1b   :  { %p389_p11 = scmp.ne.s32.totalorder %s20_s18, %s388_s10  ;;  %p394_p13 = scmp.lt.s32.totalorder %s388_s10, %s388_s10 }
  0x1d   :  { %p395_p0 = por %p394_p13, %p393_p12 }
  0x1f   :  { %p396_p1 = pnand %p395_p0, %p389_p11 }
  0x21   :  { %399 = shalt.err (!%p396_p1)
}
  0x22   :  { %22 = dma.hbm_to_vmem [thread:$0]  %s592_s0, 128, %s20_s18, [#allocation5]  }
  0x23   :  { %s476_s12 = smov [#allocation9]   ;;  %s477_s14 = smov [#allocation10]  }
  0x24   :  { %s39_s13 = sshll.u32 %s476_s12, 4  ;;  %s49_s15 = sshll.u32 %s477_s14, 4  ;;  %s40_s13 = int_to_ptr.vmem [resolvable:$true] %s39_s13  ;;  %s50_s15 = int_to_ptr.vmem [resolvable:$true] %s49_s15 }
  0x25   :  { %s400_s19 = scalar_lea.hbm %s594_s2, 128 }
  0x26   :  { %p401_p2 = scmp.ne.s32.totalorder %s594_s2, %s400_s19  ;;  %p404_p3 = scmp.lt.u32.totalorder %s400_s19, %s594_s2 }
  0x28   :  { %p406_p4 = pnand %p404_p3, %p401_p2 }
  0x2a   :  { %409 = shalt.err (!%p406_p4)
}
  0x2b   :  { %s410_s0 = scalar_lea.vmem %s40_s13, 128  ;;  %p415_p6 = scmp.lt.s32.totalorder %s40_s13, %s40_s13 }
  0x2c   :  { %p411_p5 = scmp.ne.s32.totalorder %s40_s13, %s410_s0  ;;  %p416_p7 = scmp.lt.s32.totalorder %s410_s0, %s410_s0 }
  0x2e   :  { %p417_p8 = por %p416_p7, %p415_p6 }
  0x30   :  { %p418_p9 = pnand %p417_p8, %p411_p5 }
  0x32   :  { %421 = shalt.err (!%p418_p9)
}
  0x33   :  { %42 = dma.hbm_to_vmem [thread:$0]  %s594_s2, 128, %s40_s13, [#allocation8]  }
  0x34   :  { %s422_s27 = scalar_lea.hbm %s595_s3, 128 }
  0x35   :  { %p423_p10 = scmp.ne.s32.totalorder %s595_s3, %s422_s27  ;;  %p426_p11 = scmp.lt.u32.totalorder %s422_s27, %s595_s3 }
  0x37   :  { %p428_p12 = pnand %p426_p11, %p423_p10 }
  0x39   :  { %431 = shalt.err (!%p428_p12)
}
  0x3a   :  { %s432_s6 = scalar_lea.vmem %s50_s15, 128  ;;  %p437_p0 = scmp.lt.s32.totalorder %s50_s15, %s50_s15 }
  0x3b   :  { %p433_p13 = scmp.ne.s32.totalorder %s50_s15, %s432_s6  ;;  %p438_p1 = scmp.lt.s32.totalorder %s432_s6, %s432_s6 }
  0x3d   :  { %p439_p2 = por %p438_p1, %p437_p0 }
  0x3f   :  { %p440_p3 = pnand %p439_p2, %p433_p13 }
  0x41   :  { %443 = shalt.err (!%p440_p3)
}
  0x42   :  { %52 = dma.hbm_to_vmem [thread:$0]  %s595_s3, 128, %s50_s15, [#allocation11]  }
  0x43   :  { %466 = dma.done.wait [#allocation5], 128  }
  0x44   :  { %467 = vsyncadd [#allocation5], 4294967168 }
  0x45   :  { %468 = dma.done.wait [#allocation8], 256  }
  0x46   :  { %469 = vsyncadd [#allocation8], 4294967040 }
  0x47   :  { %470 = dma.done.wait [#allocation11], 128  }
  0x48   :  { %471 = vsyncadd [#allocation11], 4294967168  ;;  %vm68_vm0 = vcmask 261120   ;;  %v84_v0 = vld [vmem:[#allocation9] sm:$0xff]  ;;  %v85_v1 = vld [vmem:[#allocation10] sm:$0xff]  ;;  %vm206_vm2 = vcmask 7168   ;;  %v187_v33 = vlaneseq }
  0x49   :  { %v65_v2 = vld [vmem:[#allocation4] sm:$0xff]  ;;  %v86_v3 = vmul.f32 %v84_v0, %v84_v0  ;;  %v87_v4 = vmul.f32 %v85_v1, %v85_v1  ;;  %v66_v6 = vld [vmem:[#allocation7] sm:$0xff]  ;;  %vm319_vm1 = vmpackc.low %vm68_vm0, %vm68_vm0  ;;  %v478_v32 = vmov -1e+30   ;;  %vm213_vm5 = vcmask 130048   ;;  %s481_s3 = smov [#allocation12]  }
  0x4a   :  { %v67_v5 = vmul.f32 %v65_v2, %v65_v2  ;;  %v75_v7 = vmul.f32 %v66_v6, %v66_v6  ;;  %208 = vst.msk [vmem:[#allocation2 + $0x8] sm:$0xff] %vm206_vm2, %v478_v32  ;;  %207 = vst.msk [vmem:[#allocation2] sm:$0xff] %vm206_vm2, %v478_v32  ;;  %v188_v34 = vshrl.u32 %v187_v33, 7  ;;  %v191_v36 = vand.u32 127, %v187_v33  ;;  %s289_s8 = sshll.u32 %s481_s3, 4  ;;  %s290_s8 = int_to_ptr.vmem [resolvable:$true] %s289_s8 }
  0x4b   :  { %v88_v8 = vsel %vm68_vm0, %v86_v3, 0.0  ;;  %v91_v10 = vsel %vm68_vm0, %v87_v4, 0.0  ;;  %v479_v43 = vmov 0   ;;  %v480_v44 = vmov 0.0   ;;  %s444_s9 = scalar_lea.vmem %s290_s8, 256  ;;  %p449_p5 = scmp.lt.s32.totalorder %s290_s8, %s290_s8 }
  0x4c   :  { %v69_v9 = vsel %vm68_vm0, %v67_v5, 0.0  ;;  %89 = vadd.xlane.f32.xlu0 %v88_v8  ;;  %v76_v11 = vsel %vm68_vm0, %v75_v7, 0.0  ;;  %v189_v35 = vadd.s32 8, %v188_v34  ;;  %vm193_vm4 = vcmp.eq.s32.totalorder %v188_v34, %v191_v36  ;;  %335 = vset.pattern.permute.xlu1 %v479_v43  ;;  %210 = vst.msk [vmem:[#allocation3 + $0x8] sm:$0xff] %vm206_vm2, %v480_v44  ;;  %209 = vst.msk [vmem:[#allocation3] sm:$0xff] %vm206_vm2, %v480_v44  ;;  %p445_p4 = scmp.ne.s32.totalorder %s290_s8, %s444_s9  ;;  %p450_p6 = scmp.lt.s32.totalorder %s444_s9, %s444_s9 }
  0x4d   :  { %70 = vadd.xlane.f32.xlu1 %v69_v9  ;;  %334 = vset.pattern.permute.xlu0 %v479_v43 }
  0x4e   :  { %vm194_vm3 = vcmp.eq.s32.totalorder %v189_v35, %v191_v36  ;;  %p451_p7 = por %p450_p6, %p449_p5 }
  0x50   :  { %92 = vadd.xlane.f32.xlu0 %v91_v10  ;;  %p452_p8 = pnand %p451_p7, %p445_p4 }
  0x51   :  { %77 = vadd.xlane.f32.xlu1 %v76_v11  ;;  %v212_v45 = vld [vmem:[#allocation2 + $0x8] sm:$0xff]  ;;  %v211_v46 = vld [vmem:[#allocation2] sm:$0xff] }
  0x53   :  { %v229_v3 = vld [vmem:[#allocation3 + $0x8] sm:$0xff]  ;;  %v228_v5 = vld [vmem:[#allocation3] sm:$0xff] }
  0xd9   :  { %v90_v12 = vpop.xlane.xlu0 %89 }
  0xda   :  { %v71_v13 = vpop.xlane.xlu1 %70  ;;  %v94_v14 = vmax.f32 %v90_v12, 1e-08 }
  0xdb   :  { %v72_v15 = vmax.f32 %v71_v13, 1e-08 }
  0xdd   :  { %v93_v16 = vpop.xlane.xlu0 %92  ;;  %336 = vrsqrt.f32 %v72_v15 }
  0xde   :  { %v78_v17 = vpop.xlane.xlu1 %77  ;;  %338 = vrsqrt.f32 %v94_v14  ;;  %v95_v18 = vmax.f32 %v93_v16, 1e-08 }
  0xdf   :  { %v79_v19 = vmax.f32 %v78_v17, 1e-08 }
  0xe0   :  { %340 = vrsqrt.f32 %v95_v18 }
  0xe1   :  { %342 = vrsqrt.f32 %v79_v19 }
  0xe7   :  { %v337_v20 = vpop.eup %336 }
  0xe8   :  { %v339_v21 = vpop.eup %338  ;;  %v74_v22 = vmul.f32 %v337_v20, %v65_v2 }
  0xe9   :  { %v98_v26 = vmul.f32 %v339_v21, %v84_v0 }
  0xea   :  { %v341_v23 = vpop.eup %340  ;;  %v82_v24 = vmul.f32 2.0, %v74_v22 }
  0xeb   :  { %v343_v25 = vpop.eup %342  ;;  %v99_v27 = vmul.f32 %v341_v23, %v85_v1 }
  0xec   :  { %315 = vmatprep.mubr.msk.f32.mxu0 %vm68_vm0, %v82_v24  ;;  %v81_v28 = vmul.f32 %v343_v25, %v66_v6 }
  0xed   :  { %v318_v29 = vpack.c.bf16 %v99_v27, %v98_v26 }
  0xee   :  { %v274_v30 = vmul.f32 %v81_v28, %v74_v22  ;;  %v83_v31 = vmul.f32 2.0, %v81_v28 }
  0xef   :  { %320 = vmatprep.subr.msk.bf16.mxu0 %vm319_vm1, %v318_v29 }
  0xf0   :  { %323 = vmatpush3.bf16.xpose.msk.msra.mxu0 %vm319_vm1, %v318_v29  ;;  %v275_v63 = vsel %vm68_vm0, %v274_v30, 0.0 }
  0xf7   :  { %316 = vmatmul.mubr.msk.f32.vlgmr.msra.gmra.mrb[0].mxu0 %vm68_vm0, %v83_v31 }
 0x1ca   :  { %v317_v37 = vpop.f32.mrb[0].mxu0 }
 0x1cb   :  { %v201_v38 = vsel %vm194_vm3, -1e+30, %v317_v37  ;;  %v178_v39 = vpop.f32.mrb[1].mxu0 }
 0x1cc   :  { %v200_v40 = vsel %vm193_vm4, -1e+30, %v178_v39  ;;  %v217_v41 = vsel %vm213_vm5, %v201_v38, -inf }
 0x1cd   :  { %218 = vmax.xlane.f32.xlu1 %v217_v41  ;;  %v214_v42 = vsel %vm213_vm5, %v200_v40, -inf }
 0x1ce   :  { %215 = vmax.xlane.f32.xlu0 %v214_v42 }
 0x25a   :  { %v219_v47 = vpop.xlane.xlu1 %218 }
 0x25b   :  { %v221_v48 = vmax.f32 %v212_v45, %v219_v47  ;;  %v216_v49 = vpop.xlane.xlu0 %215 }
 0x25c   :  { %v220_v50 = vmax.f32 %v211_v46, %v216_v49 }
 0x25d   :  { %v223_v51 = vsub.f32 %v212_v45, %v221_v48  ;;  %260 = vst.msk [vmem:[#allocation2 + $0x8] sm:$0xff] %vm206_vm2, %v221_v48  ;;  %239 = vperm.xlu1 %335, %v221_v48  }
 0x25e   :  { %v222_v52 = vsub.f32 %v211_v46, %v220_v50  ;;  %259 = vst.msk [vmem:[#allocation2] sm:$0xff] %vm206_vm2, %v220_v50  ;;  %234 = vperm.xlu0 %334, %v220_v50  }
 0x25f   :  { %v226_v0 = vmul.f32 1.442695, %v223_v51 }
 0x260   :  { %v224_v1 = vmul.f32 1.442695, %v222_v52 }
 0x264   :  { %v265_v18 = vld [vmem:[#allocation2 + $0x8] sm:$0xff] }
 0x265   :  { %v264_v20 = vld [vmem:[#allocation2] sm:$0xff] }
 0x2dc   :  { %v240_v53 = vpop.permute.xlu1 %239 }
 0x2dd   :  { %v243_v54 = vsub.f32 %v201_v38, %v240_v53  ;;  %v235_v55 = vpop.permute.xlu0 %234 }
 0x2de   :  { %v242_v56 = vsub.f32 %v200_v40, %v235_v55 }
 0x2df   :  { %v246_v57 = vmul.f32 1.442695, %v243_v54 }
 0x2e0   :  { %v244_v58 = vmul.f32 1.442695, %v242_v56 }
 0x2e1   :  { %344 = vpow2.f32 %v246_v57 }
 0x2e2   :  { %346 = vpow2.f32 %v244_v58 }
 0x2e3   :  { %348 = vpow2.f32 %v226_v0 }
 0x2e4   :  { %350 = vpow2.f32 %v224_v1 }
 0x2eb   :  { %v345_v59 = vpop.eup %344 }
 0x2ec   :  { %v347_v60 = vpop.eup %346  ;;  %v251_v61 = vsel %vm213_vm5, %v345_v59, 0.0 }
 0x2ed   :  { %252 = vadd.xlane.f32.xlu0 %v251_v61  ;;  %v248_v62 = vsel %vm213_vm5, %v347_v60, 0.0  ;;  %v349_v2 = vpop.eup %348 }
 0x2ee   :  { %249 = vadd.xlane.f32.xlu1 %v248_v62  ;;  %v351_v4 = vpop.eup %350  ;;  %v231_v6 = vmul.f32 %v349_v2, %v229_v3 }
 0x2ef   :  { %v230_v8 = vmul.f32 %v351_v4, %v228_v5 }
 0x2f2   :  { %276 = vadd.xlane.f32.xlu1 %v275_v63 }
 0x37a   :  { %v253_v7 = vpop.xlane.xlu0 %252 }
 0x37b   :  { %v255_v9 = vadd.f32 %v253_v7, %v231_v6  ;;  %v250_v10 = vpop.xlane.xlu1 %249 }
 0x37c   :  { %v254_v11 = vadd.f32 %v250_v10, %v230_v8 }
 0x37d   :  { %258 = vst.msk [vmem:[#allocation3 + $0x8] sm:$0xff] %vm206_vm2, %v255_v9 }
 0x37e   :  { %257 = vst.msk [vmem:[#allocation3] sm:$0xff] %vm206_vm2, %v254_v11 }
 0x37f   :  { %v277_v15 = vpop.xlane.xlu1 %276 }
 0x380   :  { %v278_v22 = vmul.f32 2.0, %v277_v15 }
 0x384   :  { %v267_v12 = vld [vmem:[#allocation3 + $0x8] sm:$0xff] }
 0x385   :  { %v266_v13 = vld [vmem:[#allocation3] sm:$0xff]  ;;  %352 = vlog2.f32 %v267_v12 }
 0x386   :  { %354 = vlog2.f32 %v266_v13 }
 0x38f   :  { %v353_v14 = vpop.eup %352 }
 0x390   :  { %v355_v16 = vpop.eup %354  ;;  %v271_v17 = vmul.f32 0.6931472, %v353_v14 }
 0x391   :  { %v269_v19 = vmul.f32 0.6931472, %v355_v16 }
 0x392   :  { %v273_v21 = vadd.f32 %v271_v17, %v265_v18 }
 0x393   :  { %v272_v23 = vadd.f32 %v269_v19, %v264_v20 }
 0x394   :  { %v280_v24 = vsub.f32 %v273_v21, %v278_v22 }
 0x395   :  { %v279_v25 = vsub.f32 %v272_v23, %v278_v22 }
 0x396   :  { %283 = vst.msk [vmem:[#allocation12 + $0x8] sm:$0xff] %vm206_vm2, %v280_v24 }
 0x397   :  { %281 = vst.msk [vmem:[#allocation12] sm:$0xff] %vm206_vm2, %v279_v25 }
 0x398   :  { %455 = shalt.err (!%p452_p8)
}
 0x399   :  { %s456_s11 = scalar_lea.hbm %s596_s4, 256 }
 0x39a   :  { %p457_p9 = scmp.ne.s32.totalorder %s596_s4, %s456_s11  ;;  %p460_p10 = scmp.lt.u32.totalorder %s456_s11, %s596_s4 }
 0x39c   :  { %p462_p11 = pnand %p460_p10, %p457_p9 }
 0x39e   :  { %465 = shalt.err (!%p462_p11)
}
 0x39f   :  { %s482_s16 = smov 128   ;;  %s483_s17 = smov 8  }
 0x3a0   :  { %295 = dma.vmem_to_hbm [thread:$0]  %s290_s8, 256, %s596_s4, [#allocation6], %s482_s16, %s482_s16, %s483_s17  }
 0x3a1   :  { %472 = dma.done.wait [#allocation6], 256  }
 0x3a2   :  { %473 = vsyncadd [#allocation6], 4294967040 }
 0x3a3   :  { %299 = vsyncpa [#allocation5], 1 }
 0x3a4   :  { %300 = vsyncpa [#allocation8], 1 }
 0x3a5   :  { %301 = vsyncpa [#allocation11], 1 }
 0x3a6   :  { %302 = vsyncpa [#allocation6], 1 }

</bundles_post_ra>
